<compile_context>
chip_gen: v7x
topology: tpu7x:2x2x1
jax: 0.10.0
libtpu: 0.0.40
codegen_flags: <defaults>
</compile_context>

<pallas_src>
import jax
import jax.numpy as jnp
from jax.experimental import pallas as pl
from jax.experimental.pallas import tpu as pltpu


# ---------------------------------------------------------------------------
# helpers
# ---------------------------------------------------------------------------
def _round_up(x, m):
    return (x + m - 1) // m * m


def _pick_tile(n_pad):
    """Largest tile (multiple of 128, <= 1024) dividing the padded node count."""
    m = n_pad // 128
    for d in range(min(m, 8), 0, -1):
        if m % d == 0:
            return 128 * d
    return 128


def _padded_bytes(rows, cols, dtype_bytes):
    # (8, 128)-tile padded VMEM footprint of a 2-D buffer.
    return _round_up(rows, 8) * _round_up(cols, 128) * dtype_bytes


def _pad2(a, rows, cols):
    """Zero-pad a 2-D array to (rows, cols)."""
    out = jnp.zeros((rows, cols), a.dtype)
    return out.at[: a.shape[0], : a.shape[1]].set(a)


# ---------------------------------------------------------------------------
# kernel 1: per-node feature transform
#   u = h @ W_rel           (bf16, consumed by the MXU against the adjacency)
#   r = h @ W_root + bias   (f32 residual added in the streaming epilogue)
# ---------------------------------------------------------------------------
def _feature_transform_kernel(h_ref, w_rel_ref, w_root_ref, b_ref, u_ref, r_ref):
    h = h_ref[...]
    u_ref[...] = jnp.dot(h, w_rel_ref[...],
                         preferred_element_type=jnp.float32).astype(jnp.bfloat16)
    r_ref[...] = (jnp.dot(h, w_root_ref[...], preferred_element_type=jnp.float32)
                  + b_ref[...])


def _feature_transform(h, w_rel, w_root, b, tile):
    n_pad, c_in = h.shape
    c_out = w_rel.shape[1]                   # lane-dense: multiple of 128
    flops = 2 * 2 * n_pad * c_in * c_out
    bytes_accessed = (n_pad * c_in * 4 + n_pad * c_out * (2 + 4)
                      + 2 * c_in * c_out * 4 + c_out * 4)
    return pl.pallas_call(
        _feature_transform_kernel,
        out_shape=(jax.ShapeDtypeStruct((n_pad, c_out), jnp.bfloat16),
                   jax.ShapeDtypeStruct((n_pad, c_out), jnp.float32)),
        grid_spec=pltpu.PrefetchScalarGridSpec(
            num_scalar_prefetch=0,
            grid=(n_pad // tile,),
            in_specs=[
                pl.BlockSpec((tile, c_in), lambda i: (i, 0)),
                pl.BlockSpec((c_in, c_out), lambda i: (0, 0)),
                pl.BlockSpec((c_in, c_out), lambda i: (0, 0)),
                pl.BlockSpec((1, c_out), lambda i: (0, 0)),
            ],
            out_specs=[
                pl.BlockSpec((tile, c_out), lambda i: (i, 0)),
                pl.BlockSpec((tile, c_out), lambda i: (i, 0)),
            ],
        ),
        compiler_params=pltpu.CompilerParams(dimension_semantics=("parallel",)),
        cost_estimate=pl.CostEstimate(flops=int(flops), transcendentals=0,
                                      bytes_accessed=int(bytes_accessed)),
    )(h, w_rel, w_root, b)


# ---------------------------------------------------------------------------
# kernel 2: streamed aggregation   h_out = relu(A @ u + r)
#   adj: streamed (row-tile, k-tile) bf16 blocks; u: VMEM-resident bf16;
#   agg: f32 scratch accumulator (init at k==0, finalize at k==last).
# ---------------------------------------------------------------------------
def _graph_aggregate_kernel(adj_ref, u_ref, r_ref, h_out_ref, agg_ref):
    k = pl.program_id(1)

    @pl.when(k == 0)
    def _init():
        agg_ref[...] = jnp.zeros_like(agg_ref)

    tk = adj_ref.shape[1]
    start = pl.multiple_of(k * tk, tk)
    u_k = u_ref[pl.ds(start, tk), :]                       # bf16 slice of resident u
    agg_ref[...] += jnp.dot(adj_ref[...], u_k,             # bf16 x bf16 -> f32 acc
                            preferred_element_type=jnp.float32)

    @pl.when(k == pl.num_programs(1) - 1)
    def _finalize():
        # Elementwise epilogue kept in f32 (bias/root residual + relu): v5e-safe.
        h_out_ref[...] = jnp.maximum(agg_ref[...] + r_ref[...], 0.0)


def _graph_aggregate(adj, u, r, tile):
    n_pad = adj.shape[0]
    c_out = u.shape[1]                       # lane-dense: multiple of 128

    vmem_limit = (
        2 * _padded_bytes(tile, tile, 2)        # adj tiles (bf16, double-buffered)
        + 2 * _padded_bytes(n_pad, c_out, 2)    # resident u (bf16)
        + 2 * _padded_bytes(tile, c_out, 4)     # r tiles
        + 2 * _padded_bytes(tile, c_out, 4)     # output tiles
        + _padded_bytes(tile, c_out, 4)         # f32 accumulator scratch
        + (8 << 20))                            # headroom for compiler internals
    vmem_limit = int(min(vmem_limit, 64 << 20))  # do not exceed v7x physical VMEM

    flops = 2 * n_pad * n_pad * c_out
    bytes_accessed = n_pad * n_pad * 2 + n_pad * c_out * (2 + 4 + 4)

    return pl.pallas_call(
        _graph_aggregate_kernel,
        out_shape=jax.ShapeDtypeStruct((n_pad, c_out), jnp.float32),
        grid_spec=pltpu.PrefetchScalarGridSpec(
            num_scalar_prefetch=0,
            grid=(n_pad // tile, n_pad // tile),
            in_specs=[
                pl.BlockSpec((tile, tile), lambda i, k: (i, k)),    # adj: streamed
                pl.BlockSpec((n_pad, c_out), lambda i, k: (0, 0)),  # u: resident
                pl.BlockSpec((tile, c_out), lambda i, k: (i, 0)),   # r: per row tile
            ],
            out_specs=pl.BlockSpec((tile, c_out), lambda i, k: (i, 0)),
            scratch_shapes=[pltpu.VMEM((tile, c_out), jnp.float32)],
        ),
        compiler_params=pltpu.CompilerParams(
            dimension_semantics=("parallel", "arbitrary"),
            vmem_limit_bytes=vmem_limit),
        cost_estimate=pl.CostEstimate(flops=int(flops), transcendentals=0,
                                      bytes_accessed=int(bytes_accessed)),
    )(adj, u, r)


# ---------------------------------------------------------------------------
# kernel 3: global_mean_pool + final Linear (tiny; lane-padded output)
# ---------------------------------------------------------------------------
def _pool_linear_kernel(pool_ref, h_ref, wl_ref, bl_ref, out_ref):
    pooled = jnp.dot(pool_ref[...], h_ref[...], preferred_element_type=jnp.float32)
    out_ref[...] = (jnp.dot(pooled, wl_ref[...], preferred_element_type=jnp.float32)
                    + bl_ref[...])


def _pool_linear(pool, h, wl, bl, num_classes):
    num_graphs = pool.shape[0]
    hid_pad = h.shape[1]
    c_pad = _round_up(num_classes, 128)      # lane-dense output -> unmasked stores
    wl_pad = _pad2(wl, hid_pad, c_pad)       # zero rows/cols: padded h cols are zero too
    bl_pad = _pad2(bl, 1, c_pad)
    vmem = pl.BlockSpec(memory_space=pltpu.MemorySpace.VMEM)
    out = pl.pallas_call(
        _pool_linear_kernel,
        out_shape=jax.ShapeDtypeStruct((num_graphs, c_pad), jnp.float32),
        in_specs=[vmem, vmem, vmem, vmem],
        out_specs=vmem,
    )(pool, h, wl_pad, bl_pad)
    return out[:, :num_classes]


# ---------------------------------------------------------------------------
# graph pre-processing (dense, zero-padded) + full forward pass
# ---------------------------------------------------------------------------
def build_adjacency(edge_index, padded_nodes):
    # edge_index[0] = source, edge_index[1] = target; aggregate at target.
    src, tgt = edge_index[0], edge_index[1]
    adj = jnp.zeros((padded_nodes, padded_nodes), jnp.float32)
    adj = adj.at[tgt, src].add(1.0)
    return adj.astype(jnp.bfloat16)          # small integer edge counts: exact in bf16


def build_pool(batch, num_graphs, padded_nodes):
    n = batch.shape[0]
    batch_pad = jnp.full((padded_nodes,), -1, jnp.int32).at[:n].set(batch.astype(jnp.int32))
    onehot = (batch_pad[None, :] == jnp.arange(num_graphs)[:, None]).astype(jnp.float32)
    counts = jnp.maximum(onehot.sum(axis=1, keepdims=True), 1.0)
    return onehot / counts                   # (G, padded_nodes); padded cols are zero


def graph_classifier(x, edge_index, batch, num_graphs, params):
    (w1_root, w1_rel, b1, w2_root, w2_rel, b2, wl, bl) = params
    n = x.shape[0]
    c_in = x.shape[1]
    hid = w1_rel.shape[1]
    num_classes = wl.shape[1]

    n_pad = _round_up(max(n, 1), 128)
    tile = _pick_tile(n_pad)
    hid_pad = _round_up(hid, 128)            # lane-dense hidden dim (padded cols stay 0)

    adj = build_adjacency(edge_index, n_pad)            # (Np, Np) bf16, streamed
    pool = build_pool(batch, num_graphs, n_pad)         # (G, Np) f32
    x_pad = jnp.zeros((n_pad, c_in), jnp.float32).at[:n].set(x)

    # Zero-pad weights to the lane-dense hidden dim (exact: zero cols -> zero features).
    w1_rel_p = _pad2(w1_rel, c_in, hid_pad)
    w1_root_p = _pad2(w1_root, c_in, hid_pad)
    b1_p = _pad2(b1, 1, hid_pad)
    w2_rel_p = _pad2(w2_rel, hid_pad, hid_pad)
    w2_root_p = _pad2(w2_root, hid_pad, hid_pad)
    b2_p = _pad2(b2, 1, hid_pad)

    # GraphConv 1 + relu
    u1, r1 = _feature_transform(x_pad, w1_rel_p, w1_root_p, b1_p, tile)
    h1 = _graph_aggregate(adj, u1, r1, tile)
    # GraphConv 2 + relu
    u2, r2 = _feature_transform(h1, w2_rel_p, w2_root_p, b2_p, tile)
    h2 = _graph_aggregate(adj, u2, r2, tile)
    # global_mean_pool + Linear
    return _pool_linear(pool, h2, wl, bl, num_classes)


if __name__ == "__main__":
    key = jax.random.PRNGKey(0)

    # Small, module-consistent shapes.
    N = 16            # nodes
    E = 40            # edges
    IN_CH = 8         # in_channels
    HID = 32          # hidden_channels
    CLASSES = 4       # num_classes
    G = 2             # graphs in the batch

    keys = jax.random.split(key, 10)

    x = jax.random.normal(keys[0], (N, IN_CH), jnp.float32)
    edge_index = jax.random.randint(keys[1], (2, E), 0, N)
    batch = jnp.concatenate([jnp.zeros(N // 2, jnp.int32),
                             jnp.ones(N - N // 2, jnp.int32)])

    # GraphConv(in, out): lin_rel = Linear(in, out, bias=True),
    #                     lin_root = Linear(in, out, bias=False).
    def lin_w(k, fan_in, fan_out):
        bound = 1.0 / jnp.sqrt(fan_in)
        return jax.random.uniform(k, (fan_in, fan_out), jnp.float32, -bound, bound)

    w1_rel = lin_w(keys[2], IN_CH, HID)
    w1_root = lin_w(keys[3], IN_CH, HID)
    b1 = jax.random.uniform(keys[4], (1, HID), jnp.float32,
                            -1.0 / jnp.sqrt(IN_CH), 1.0 / jnp.sqrt(IN_CH))
    w2_rel = lin_w(keys[5], HID, HID)
    w2_root = lin_w(keys[6], HID, HID)
    b2 = jax.random.uniform(keys[7], (1, HID), jnp.float32,
                            -1.0 / jnp.sqrt(HID), 1.0 / jnp.sqrt(HID))
    wl = lin_w(keys[8], HID, CLASSES)
    bl = jax.random.uniform(keys[9], (1, CLASSES), jnp.float32,
                            -1.0 / jnp.sqrt(HID), 1.0 / jnp.sqrt(HID))

    params = (w1_root, w1_rel, b1, w2_root, w2_rel, b2, wl, bl)

    out = graph_classifier(x, edge_index, batch, G, params)
    out = jax.block_until_ready(out)
    assert out.shape == (G, CLASSES)

    # ---------------- references ----------------
    adj_f32 = jnp.zeros((N, N), jnp.float32).at[edge_index[1], edge_index[0]].add(1.0)
    onehot = (batch[None, :] == jnp.arange(G)[:, None]).astype(jnp.float32)
    pool_f32 = onehot / jnp.maximum(onehot.sum(axis=1, keepdims=True), 1.0)

    def bf(z):  # mimic the kernel's bf16 rounding of the MXU inputs
        return z.astype(jnp.bfloat16).astype(jnp.float32)

    # (1) matched reference: same math / same bf16 rounding points as the kernels
    mu1 = bf(x @ w1_rel); mr1 = x @ w1_root + b1
    mh1 = jnp.maximum(bf(adj_f32) @ mu1 + mr1, 0.0)
    mu2 = bf(mh1 @ w2_rel); mr2 = mh1 @ w2_root + b2
    mh2 = jnp.maximum(bf(adj_f32) @ mu2 + mr2, 0.0)
    ref_matched = (pool_f32 @ mh2) @ wl + bl

    # (2) pure-f32 module semantics (GraphConv x2 + relu + mean-pool + linear)
    g1 = jnp.maximum((adj_f32 @ x) @ w1_rel + b1 + x @ w1_root, 0.0)
    g2 = jnp.maximum((adj_f32 @ g1) @ w2_rel + b2 + g1 @ w2_root, 0.0)
    ref_module = (pool_f32 @ g2) @ wl + bl

    assert jnp.allclose(out, ref_matched, atol=5e-3, rtol=5e-3)
    assert jnp.allclose(out, ref_module, atol=1e-1, rtol=1e-1)
    print("KERNEL_OK")
</pallas_src>

<mosaic_0001>
module attributes {stable_mosaic.version = 11 : i64} {
  func.func @_feature_transform_kernel(%arg0: i32, %arg1: memref<128x8xf32, #tpu.memory_space<vmem>>, %arg2: memref<8x128xf32, #tpu.memory_space<vmem>>, %arg3: memref<8x128xf32, #tpu.memory_space<vmem>>, %arg4: memref<1x128xf32, #tpu.memory_space<vmem>>, %arg5: memref<128x128xbf16, #tpu.memory_space<vmem>>, %arg6: memref<128x128xf32, #tpu.memory_space<vmem>>) attributes {dimension_semantics = [#tpu.dimension_semantics<parallel>], iteration_bounds = array<i64: 1>, scalar_prefetch = 0 : i64, scratch_operands = 0 : i64, tpu.core_type = #tpu.core_type<tc>, window_params = [{transform_indices = @transform_0, window_bounds = array<i64: 128, 8>}, {pipeline_mode = #tpu.pipeline_mode<synchronous>, transform_indices = @transform_1, window_bounds = array<i64: 8, 128>}, {pipeline_mode = #tpu.pipeline_mode<synchronous>, transform_indices = @transform_2, window_bounds = array<i64: 8, 128>}, {pipeline_mode = #tpu.pipeline_mode<synchronous>, transform_indices = @transform_3, window_bounds = array<i64: 1, 128>}, {transform_indices = @transform_4, window_bounds = array<i64: 128, 128>}, {transform_indices = @transform_5, window_bounds = array<i64: 128, 128>}]} {
    %c0 = arith.constant 0 : index
    %c0_0 = arith.constant 0 : index
    %0 = vector.load %arg1[%c0, %c0_0] : memref<128x8xf32, #tpu.memory_space<vmem>>, vector<128x8xf32>
    %c0_1 = arith.constant 0 : index
    %c0_2 = arith.constant 0 : index
    %1 = vector.load %arg2[%c0_1, %c0_2] : memref<8x128xf32, #tpu.memory_space<vmem>>, vector<8x128xf32>
    %cst = arith.constant dense<0.000000e+00> : vector<128x128xf32>
    %2 = tpu.matmul %0, %1, %cst {dimension_numbers = #tpu.dot_dimension_numbers<[1], [0], [0], [1], [0, 0, 1, 1], [], []>} : vector<128x8xf32>, vector<8x128xf32>, vector<128x128xf32> -> vector<128x128xf32>
    %3 = arith.truncf %2 : vector<128x128xf32> to vector<128x128xbf16>
    %c0_3 = arith.constant 0 : index
    %c0_4 = arith.constant 0 : index
    %4 = vector.load %arg5[%c0_3, %c0_4] : memref<128x128xbf16, #tpu.memory_space<vmem>>, vector<128x128xbf16>
    tpu.vector_store %arg5[%c0_3, %c0_4], %3 {strides = array<i32>} : memref<128x128xbf16, #tpu.memory_space<vmem>>, vector<128x128xbf16>,
    %c0_5 = arith.constant 0 : index
    %c0_6 = arith.constant 0 : index
    %5 = vector.load %arg3[%c0_5, %c0_6] : memref<8x128xf32, #tpu.memory_space<vmem>>, vector<8x128xf32>
    %cst_7 = arith.constant dense<0.000000e+00> : vector<128x128xf32>
    %6 = tpu.matmul %0, %5, %cst_7 {dimension_numbers = #tpu.dot_dimension_numbers<[1], [0], [0], [1], [0, 0, 1, 1], [], []>} : vector<128x8xf32>, vector<8x128xf32>, vector<128x128xf32> -> vector<128x128xf32>
    %c0_8 = arith.constant 0 : index
    %c0_9 = arith.constant 0 : index
    %7 = vector.load %arg4[%c0_8, %c0_9] : memref<1x128xf32, #tpu.memory_space<vmem>>, vector<1x128xf32>
    %8 = vector.broadcast %7 : vector<1x128xf32> to vector<128x128xf32>
    %9 = arith.addf %6, %8 : vector<128x128xf32>
    %c0_10 = arith.constant 0 : index
    %c0_11 = arith.constant 0 : index
    %10 = vector.load %arg6[%c0_10, %c0_11] : memref<128x128xf32, #tpu.memory_space<vmem>>, vector<128x128xf32>
    tpu.vector_store %arg6[%c0_10, %c0_11], %9 {strides = array<i32>} : memref<128x128xf32, #tpu.memory_space<vmem>>, vector<128x128xf32>,
    return
  }
  func.func @transform_0(%arg0: i32) -> (i32, i32) {
    %c0_i32 = arith.constant 0 : i32
    %c0_i32_0 = arith.constant 0 : i32
    return %arg0, %c0_i32 : i32, i32
  }
  func.func @transform_1(%arg0: i32) -> (i32, i32) {
    %c0_i32 = arith.constant 0 : i32
    %c0_i32_0 = arith.constant 0 : i32
    %c0_i32_1 = arith.constant 0 : i32
    return %c0_i32, %c0_i32_0 : i32, i32
  }
  func.func @transform_2(%arg0: i32) -> (i32, i32) {
    %c0_i32 = arith.constant 0 : i32
    %c0_i32_0 = arith.constant 0 : i32
    %c0_i32_1 = arith.constant 0 : i32
    return %c0_i32, %c0_i32_0 : i32, i32
  }
  func.func @transform_3(%arg0: i32) -> (i32, i32) {
    %c0_i32 = arith.constant 0 : i32
    %c0_i32_0 = arith.constant 0 : i32
    %c0_i32_1 = arith.constant 0 : i32
    return %c0_i32, %c0_i32_0 : i32, i32
  }
  func.func @transform_4(%arg0: i32) -> (i32, i32) {
    %c0_i32 = arith.constant 0 : i32
    %c0_i32_0 = arith.constant 0 : i32
    return %arg0, %c0_i32 : i32, i32
  }
  func.func @transform_5(%arg0: i32) -> (i32, i32) {
    %c0_i32 = arith.constant 0 : i32
    %c0_i32_0 = arith.constant 0 : i32
    return %arg0, %c0_i32 : i32, i32
  }
}

</mosaic_0001>

<bundles_post_ra>
// kernel: tpu_custom_call.1
= control target key start
LH: loop header
LB: loop body
LE: loop exit
PB: predicated region body
PF: predicated region fallthrough
CT: control target
= control target key end

     0   :  { %11 = vsyncpa [#allocation3], 0  ;;  %vm38_vm0 = vcmask 64512   ;;  %s939_s0 = inlined_call_operand.vmem [shape: f32[128,8], index: 0, kind: input, shape index: {}]   ;;  %s940_s1 = inlined_call_operand.vmem [shape: f32[8,128], index: 1, kind: input, shape index: {}]   ;;  %s941_s2 = inlined_call_operand.vmem [shape: f32[8,128], index: 2, kind: input, shape index: {}]   ;;  %s942_s3 = inlined_call_operand.vmem [shape: f32[1,128], index: 3, kind: input, shape index: {}]   ;;  %s943_s4 = inlined_call_operand.hbm [shape: bf16[128,128], index: 4, kind: output, shape index: {0}]   ;;  %s944_s5 = inlined_call_operand.hbm [shape: f32[128,128], index: 5, kind: output, shape index: {1}]  }
   0x1   :  { %v37_v0 = vld [vmem:[%s940_s1] sm:$0xff]  ;;  %v22_v3 = vld [vmem:[%s939_s0 + $0x8] sm:$0xff]  ;;  %v23_v4 = vld [vmem:[%s939_s0 + $0x10] sm:$0xff] }
   0x2   :  { %v312_v1 = vld [vmem:[%s941_s2] sm:$0xff]  ;;  %659 = vmatprep.subr.mxu0 %v37_v0  ;;  %v24_v5 = vld [vmem:[%s939_s0 + $0x18] sm:$0xff] }
   0x3   :  { %v21_v2 = vld [vmem:[%s939_s0] sm:$0xff]  ;;  %685 = vmatprep.subr.mxu1 %v312_v1  ;;  %660 = vmatpush3.msra.mxu0 %v37_v0 }
   0x4   :  { %661 = vmatprep.mubr.msk.f32.mxu0 %vm38_vm0, %v21_v2  ;;  %686 = vmatpush3.msra.mxu1 %v312_v1  ;;  %v25_v6 = vld [vmem:[%s939_s0 + $0x20] sm:$0xff] }
   0x5   :  { %687 = vmatprep.mubr.msk.f32.mxu1 %vm38_vm0, %v21_v2  ;;  %662 = vmatmul.mubr.msk.f32.vlgmr.msra.gmra.mrb[0].mxu0 %vm38_vm0, %v22_v3 }
   0x6   :  { %688 = vmatmul.mubr.msk.f32.vlgmr.msra.gmra.mrb[0].mxu1 %vm38_vm0, %v22_v3  ;;  %664 = vmatprep.mubr.msk.f32.mxu0 %vm38_vm0, %v23_v4 }
   0x7   :  { %690 = vmatprep.mubr.msk.f32.mxu1 %vm38_vm0, %v23_v4 }
   0x8   :  { %12 = vsyncpa [#allocation5], 0  ;;  %v26_v7 = vld [vmem:[%s939_s0 + $0x28] sm:$0xff]  ;;  %v27_v8 = vld [vmem:[%s939_s0 + $0x30] sm:$0xff]  ;;  %s766_s27 = smov [#allocation4]  }
   0x9   :  { %665 = vmatmul.mubr.msk.f32.gmra.mrb[2].mxu0 %vm38_vm0, %v24_v5  ;;  %v28_v9 = vld [vmem:[%s939_s0 + $0x38] sm:$0xff]  ;;  %v29_v10 = vld [vmem:[%s939_s0 + $0x40] sm:$0xff]  ;;  %v30_v11 = vld [vmem:[%s939_s0 + $0x48] sm:$0xff]  ;;  %s498_s28 = sshll.u32 %s766_s27, 4  ;;  %s908_s28 = int_to_ptr.vmem [resolvable:$true] %s498_s28 }
   0xa   :  { %691 = vmatmul.mubr.msk.f32.gmra.mrb[2].mxu1 %vm38_vm0, %v24_v5  ;;  %667 = vmatprep.mubr.msk.f32.mxu0 %vm38_vm0, %v25_v6  ;;  %v31_v12 = vld [vmem:[%s939_s0 + $0x50] sm:$0xff]  ;;  %v32_v13 = vld [vmem:[%s939_s0 + $0x58] sm:$0xff]  ;;  %v33_v14 = vld [vmem:[%s939_s0 + $0x60] sm:$0xff] }
   0xb   :  { %693 = vmatprep.mubr.msk.f32.mxu1 %vm38_vm0, %v25_v6  ;;  %v34_v15 = vld [vmem:[%s939_s0 + $0x68] sm:$0xff]  ;;  %v35_v16 = vld [vmem:[%s939_s0 + $0x70] sm:$0xff]  ;;  %v36_v17 = vld [vmem:[%s939_s0 + $0x78] sm:$0xff]  ;;  %s765_s0 = smov [#allocation2]  }
   0xc   :  { %v890_v18 = vld [vmem:[%s942_s3] ss:$0 sm:$0xff]  ;;  %s486_s3 = sshll.u32 %s765_s0, 4  ;;  %s487_s3 = int_to_ptr.vmem [resolvable:$true] %s486_s3 }
   0xd   :  { %668 = vmatmul.mubr.msk.f32.gmra.mrb[4].mxu0 %vm38_vm0, %v26_v7  ;;  %s717_s29 = scalar_lea.vmem %s487_s3, 1024  ;;  %p722_p1 = scmp.lt.s32.totalorder %s487_s3, %s487_s3 }
   0xe   :  { %694 = vmatmul.mubr.msk.f32.gmra.mrb[4].mxu1 %vm38_vm0, %v26_v7  ;;  %670 = vmatprep.mubr.msk.f32.mxu0 %vm38_vm0, %v27_v8  ;;  %p718_p0 = scmp.ne.s32.totalorder %s487_s3, %s717_s29  ;;  %p723_p2 = scmp.lt.s32.totalorder %s717_s29, %s717_s29 }
   0xf   :  { %696 = vmatprep.mubr.msk.f32.mxu1 %vm38_vm0, %v27_v8 }
  0x10   :  { %p724_p3 = por %p723_p2, %p722_p1 }
  0x11   :  { %671 = vmatmul.mubr.msk.f32.gmra.mrb[6].mxu0 %vm38_vm0, %v28_v9 }
  0x12   :  { %697 = vmatmul.mubr.msk.f32.gmra.mrb[6].mxu1 %vm38_vm0, %v28_v9  ;;  %673 = vmatprep.mubr.msk.f32.mxu0 %vm38_vm0, %v29_v10  ;;  %p725_p4 = pnand %p724_p3, %p718_p0 }
  0x13   :  { %699 = vmatprep.mubr.msk.f32.mxu1 %vm38_vm0, %v29_v10 }
  0x15   :  { %674 = vmatmul.mubr.msk.f32.gmra.mrb[8].mxu0 %vm38_vm0, %v30_v11 }
  0x16   :  { %700 = vmatmul.mubr.msk.f32.gmra.mrb[8].mxu1 %vm38_vm0, %v30_v11  ;;  %676 = vmatprep.mubr.msk.f32.mxu0 %vm38_vm0, %v31_v12 }
  0x17   :  { %702 = vmatprep.mubr.msk.f32.mxu1 %vm38_vm0, %v31_v12 }
  0x19   :  { %677 = vmatmul.mubr.msk.f32.gmra.mrb[10].mxu0 %vm38_vm0, %v32_v13 }
  0x1a   :  { %703 = vmatmul.mubr.msk.f32.gmra.mrb[10].mxu1 %vm38_vm0, %v32_v13  ;;  %679 = vmatprep.mubr.msk.f32.mxu0 %vm38_vm0, %v33_v14 }
  0x1b   :  { %705 = vmatprep.mubr.msk.f32.mxu1 %vm38_vm0, %v33_v14 }
  0x1d   :  { %680 = vmatmul.mubr.msk.f32.gmra.mrb[12].mxu0 %vm38_vm0, %v34_v15 }
  0x1e   :  { %706 = vmatmul.mubr.msk.f32.gmra.mrb[12].mxu1 %vm38_vm0, %v34_v15  ;;  %682 = vmatprep.mubr.msk.f32.mxu0 %vm38_vm0, %v35_v16 }
  0x1f   :  { %708 = vmatprep.mubr.msk.f32.mxu1 %vm38_vm0, %v35_v16 }
  0x21   :  { %683 = vmatmul.mubr.msk.f32.gmra.mrb[14].mxu0 %vm38_vm0, %v36_v17 }
  0x22   :  { %709 = vmatmul.mubr.msk.f32.gmra.mrb[14].mxu1 %vm38_vm0, %v36_v17 }
  0xd8   :  { %v663_v19 = vpop.f32.mrb[0].mxu0 }
  0xd9   :  { %v689_v20 = vpop.f32.mrb[0].mxu1  ;;  %v153_v22 = vpop.f32.mrb[1].mxu0 }
  0xda   :  { %v392_v21 = vadd.f32 %v689_v20, %v890_v18  ;;  %v386_v23 = vpop.f32.mrb[1].mxu1  ;;  %v581_v24 = vpack.c.bf16 %v663_v19, %v153_v22 }
  0xdb   :  { %v387_v25 = vadd.f32 %v890_v18, %v386_v23 }
  0xdc   :  { %466 = vst [vmem:[#allocation4 + $0x8] sm:$0xff] %v392_v21  ;;  %582 = vst [vmem:[#allocation2] sm:$0xff] %v581_v24   ;;  %v666_v26 = vpop.f32.mrb[2].mxu0 }
  0xdd   :  { %465 = vst [vmem:[#allocation4] sm:$0xff] %v387_v25  ;;  %v692_v27 = vpop.f32.mrb[2].mxu1  ;;  %v163_v29 = vpop.f32.mrb[3].mxu0 }
  0xde   :  { %v402_v28 = vadd.f32 %v692_v27, %v890_v18  ;;  %v396_v30 = vpop.f32.mrb[3].mxu1  ;;  %v586_v31 = vpack.c.bf16 %v666_v26, %v163_v29 }
  0xdf   :  { %v397_v32 = vadd.f32 %v890_v18, %v396_v30 }
  0xe0   :  { %468 = vst [vmem:[#allocation4 + $0x18] sm:$0xff] %v402_v28  ;;  %618 = vst [vmem:[#allocation2 + $0x8] sm:$0xff] %v586_v31   ;;  %v669_v33 = vpop.f32.mrb[4].mxu0 }
  0xe1   :  { %467 = vst [vmem:[#allocation4 + $0x10] sm:$0xff] %v397_v32  ;;  %v695_v34 = vpop.f32.mrb[4].mxu1  ;;  %v173_v36 = vpop.f32.mrb[5].mxu0 }
  0xe2   :  { %v412_v35 = vadd.f32 %v695_v34, %v890_v18  ;;  %v406_v37 = vpop.f32.mrb[5].mxu1  ;;  %v591_v38 = vpack.c.bf16 %v669_v33, %v173_v36 }
  0xe3   :  { %v407_v39 = vadd.f32 %v890_v18, %v406_v37 }
  0xe4   :  { %470 = vst [vmem:[#allocation4 + $0x28] sm:$0xff] %v412_v35  ;;  %619 = vst [vmem:[#allocation2 + $0x10] sm:$0xff] %v591_v38   ;;  %v672_v40 = vpop.f32.mrb[6].mxu0 }
  0xe5   :  { %469 = vst [vmem:[#allocation4 + $0x20] sm:$0xff] %v407_v39  ;;  %v698_v41 = vpop.f32.mrb[6].mxu1  ;;  %v183_v43 = vpop.f32.mrb[7].mxu0 }
  0xe6   :  { %v422_v42 = vadd.f32 %v698_v41, %v890_v18  ;;  %v416_v44 = vpop.f32.mrb[7].mxu1  ;;  %v596_v45 = vpack.c.bf16 %v672_v40, %v183_v43 }
  0xe7   :  { %v417_v46 = vadd.f32 %v890_v18, %v416_v44 }
  0xe8   :  { %472 = vst [vmem:[#allocation4 + $0x38] sm:$0xff] %v422_v42  ;;  %620 = vst [vmem:[#allocation2 + $0x18] sm:$0xff] %v596_v45   ;;  %v675_v47 = vpop.f32.mrb[8].mxu0 }
  0xe9   :  { %471 = vst [vmem:[#allocation4 + $0x30] sm:$0xff] %v417_v46  ;;  %v701_v48 = vpop.f32.mrb[8].mxu1  ;;  %v193_v50 = vpop.f32.mrb[9].mxu0 }
  0xea   :  { %v432_v49 = vadd.f32 %v701_v48, %v890_v18  ;;  %v426_v51 = vpop.f32.mrb[9].mxu1  ;;  %v601_v52 = vpack.c.bf16 %v675_v47, %v193_v50 }
  0xeb   :  { %v427_v53 = vadd.f32 %v890_v18, %v426_v51 }
  0xec   :  { %474 = vst [vmem:[#allocation4 + $0x48] sm:$0xff] %v432_v49  ;;  %621 = vst [vmem:[#allocation2 + $0x20] sm:$0xff] %v601_v52   ;;  %v678_v54 = vpop.f32.mrb[10].mxu0 }
  0xed   :  { %473 = vst [vmem:[#allocation4 + $0x40] sm:$0xff] %v427_v53  ;;  %v704_v55 = vpop.f32.mrb[10].mxu1  ;;  %v203_v57 = vpop.f32.mrb[11].mxu0 }
  0xee   :  { %v442_v56 = vadd.f32 %v704_v55, %v890_v18  ;;  %v436_v58 = vpop.f32.mrb[11].mxu1  ;;  %v606_v59 = vpack.c.bf16 %v678_v54, %v203_v57 }
  0xef   :  { %v437_v60 = vadd.f32 %v890_v18, %v436_v58 }
  0xf0   :  { %476 = vst [vmem:[#allocation4 + $0x58] sm:$0xff] %v442_v56  ;;  %622 = vst [vmem:[#allocation2 + $0x28] sm:$0xff] %v606_v59   ;;  %v681_v61 = vpop.f32.mrb[12].mxu0 }
  0xf1   :  { %475 = vst [vmem:[#allocation4 + $0x50] sm:$0xff] %v437_v60  ;;  %v707_v62 = vpop.f32.mrb[12].mxu1  ;;  %v213_v0 = vpop.f32.mrb[13].mxu0 }
  0xf2   :  { %v452_v63 = vadd.f32 %v707_v62, %v890_v18  ;;  %v446_v1 = vpop.f32.mrb[13].mxu1  ;;  %v611_v2 = vpack.c.bf16 %v681_v61, %v213_v0 }
  0xf3   :  { %v447_v3 = vadd.f32 %v890_v18, %v446_v1 }
  0xf4   :  { %478 = vst [vmem:[#allocation4 + $0x68] sm:$0xff] %v452_v63  ;;  %623 = vst [vmem:[#allocation2 + $0x30] sm:$0xff] %v611_v2   ;;  %v684_v4 = vpop.f32.mrb[14].mxu0 }
  0xf5   :  { %477 = vst [vmem:[#allocation4 + $0x60] sm:$0xff] %v447_v3  ;;  %v710_v5 = vpop.f32.mrb[14].mxu1  ;;  %v223_v7 = vpop.f32.mrb[15].mxu0 }
  0xf6   :  { %v462_v6 = vadd.f32 %v710_v5, %v890_v18  ;;  %v456_v8 = vpop.f32.mrb[15].mxu1  ;;  %v616_v9 = vpack.c.bf16 %v684_v4, %v223_v7 }
  0xf7   :  { %v457_v10 = vadd.f32 %v890_v18, %v456_v8 }
  0xf8   :  { %480 = vst [vmem:[#allocation4 + $0x78] sm:$0xff] %v462_v6  ;;  %624 = vst [vmem:[#allocation2 + $0x38] sm:$0xff] %v616_v9  }
  0xf9   :  { %479 = vst [vmem:[#allocation4 + $0x70] sm:$0xff] %v457_v10 }
  0xfa   :  { %728 = shalt.err (!%p725_p4)
}
  0xfb   :  { %s729_s7 = scalar_lea.hbm %s943_s4, 1024 }
  0xfc   :  { %p730_p5 = scmp.ne.s32.totalorder %s943_s4, %s729_s7  ;;  %p733_p6 = scmp.lt.u32.totalorder %s729_s7, %s943_s4 }
  0xfe   :  { %p735_p7 = pnand %p733_p6, %p730_p5 }
 0x100   :  { %738 = shalt.err (!%p735_p7)
}
 0x101   :  { %s767_s12 = smov 64   ;;  %s768_s13 = smov 4  }
 0x102   :  { %492 = dma.vmem_to_hbm [thread:$0]  %s487_s3, 1024, %s943_s4, [#allocation3], %s767_s12, %s767_s12, %s768_s13  }
 0x103   :  { %s739_s16 = scalar_lea.vmem %s908_s28, 2048  ;;  %p744_p9 = scmp.lt.s32.totalorder %s908_s28, %s908_s28 }
 0x104   :  { %p740_p8 = scmp.ne.s32.totalorder %s908_s28, %s739_s16  ;;  %p745_p10 = scmp.lt.s32.totalorder %s739_s16, %s739_s16 }
 0x106   :  { %p746_p11 = por %p745_p10, %p744_p9 }
 0x108   :  { %p747_p12 = pnand %p746_p11, %p740_p8 }
 0x10a   :  { %750 = shalt.err (!%p747_p12)
}
 0x10b   :  { %s751_s19 = scalar_lea.hbm %s944_s5, 2048 }
 0x10c   :  { %p752_p13 = scmp.ne.s32.totalorder %s944_s5, %s751_s19  ;;  %p755_p0 = scmp.lt.u32.totalorder %s751_s19, %s944_s5 }
 0x10e   :  { %p757_p1 = pnand %p755_p0, %p752_p13 }
 0x110   :  { %760 = shalt.err (!%p757_p1)
}
 0x111   :  { %s769_s4 = smov 128   ;;  %s770_s24 = smov 8  }
 0x112   :  { %504 = dma.vmem_to_hbm [thread:$0]  %s908_s28, 2048, %s944_s5, [#allocation5], %s769_s4, %s769_s4, %s770_s24  }
 0x113   :  { %761 = dma.done.wait [#allocation3], 1024  }
 0x114   :  { %762 = vsyncadd [#allocation3], 4294966272 }
 0x115   :  { %763 = dma.done.wait [#allocation5], 2048  }
 0x116   :  { %764 = vsyncadd [#allocation5], 4294965248 }
 0x117   :  { %511 = vsyncpa [#allocation3], 1 }
 0x118   :  { %512 = vsyncpa [#allocation5], 1 }

</bundles_post_ra>
